<compile_context>
chip_gen: v6e
topology: v6e:2x2x1
jax: 0.10.0
libtpu: 0.0.40
codegen_flags: <defaults>
</compile_context>

<pallas_src>
import jax
import jax.numpy as jnp
from jax.experimental import pallas as pl
from jax.experimental.pallas import tpu as pltpu

EPS = 1e-5          # nn.BatchNorm1d default eps
LEAKY_SLOPE = 0.2   # nn.LeakyReLU(0.2)
FUSION_HIDDEN = 128
FUSION_OUT = 64
PAD_OUT = 128       # lane-dense padded output width (sliced back to 64 in wrapper)


def _adaptive_bins(length, out_size):
    """PyTorch F.adaptive_avg_pool1d bin boundaries (static)."""
    bins = []
    for j in range(out_size):
        start = (j * length) // out_size
        end = -(-((j + 1) * length) // out_size)  # ceil div
        bins.append((start, end))
    return bins


def _pool_matrix(length, out_size):
    """(length, out_size) averaging matrix matching F.adaptive_avg_pool1d."""
    m = jnp.zeros((length, out_size), jnp.float32)
    for j, (s, e) in enumerate(_adaptive_bins(length, out_size)):
        m = m.at[s:e, j].set(1.0 / (e - s))
    return m


# ---------------------------------------------------------------------------
# Pallas kernel: 5 matmuls, no in-kernel pooling / concatenation.
# ---------------------------------------------------------------------------
def _fused_kernel(x_ref, y_ref, win1_ref, bn_ref, wout1_ref, bout1_ref,
                  wineff_ref, wouteff_ref, bf1_ref, wf2_ref, bf2_ref, out_ref):
    x = x_ref[...]                      # (B, input_dim)  f32
    y = y_ref[...]                      # (B, output_dim) f32
    bn = bn_ref[...]                    # (3, Din) f32: rows = bias1, gamma, beta
    bin1 = bn[0:1, :]
    gamma = bn[1:2, :]
    beta = bn[2:3, :]

    # ---- input branches (all scales fused): Linear -> LeakyReLU(0.2) -> BN(train) ----
    h = jnp.dot(x.astype(jnp.bfloat16), win1_ref[...],
                preferred_element_type=jnp.float32) + bin1            # (B, 112)
    h = jnp.where(h > 0, h, LEAKY_SLOPE * h)
    mean = jnp.mean(h, axis=0, keepdims=True)
    mean_sq = jnp.mean(h * h, axis=0, keepdims=True)
    var = mean_sq - mean * mean                                       # biased, train mode
    h = (h - mean) * jax.lax.rsqrt(var + EPS) * gamma + beta

    # ---- output branches (all scales fused): Linear -> ReLU ----
    g = jnp.dot(y.astype(jnp.bfloat16), wout1_ref[...],
                preferred_element_type=jnp.float32) + bout1_ref[...]  # (B, 56)
    g = jnp.maximum(g, 0.0)

    # ---- folded (Linear2 + adaptive_avg_pool1d + fusion Linear1) ----
    hf = jnp.dot(h.astype(jnp.bfloat16), wineff_ref[...],
                 preferred_element_type=jnp.float32)
    hf = hf + jnp.dot(g.astype(jnp.bfloat16), wouteff_ref[...],
                      preferred_element_type=jnp.float32)
    hf = jnp.maximum(hf + bf1_ref[...], 0.0)                          # (B, 128)

    # ---- fusion Linear2, padded to 128 lanes for unmasked stores ----
    out_ref[...] = jnp.dot(hf.astype(jnp.bfloat16), wf2_ref[...],
                           preferred_element_type=jnp.float32) + bf2_ref[...]


def forward(x, y, packed):
    """Run the fused forward pass.  `packed` comes from pack_for_kernel()."""
    inputs = (x, y) + tuple(packed)
    B = x.shape[0]
    # NOTE: whole-array VMEM residency, no grid.  Total footprint here is <<1 MiB.
    # TODO(synk): if feature_scales / batch ever grow large, add a grid with BlockSpec
    # tiling over the reduction dims (and a cross-tile BN reduction) to respect the
    # 64 MiB VMEM budget on v7x.
    out = pl.pallas_call(
        _fused_kernel,
        out_shape=jax.ShapeDtypeStruct((B, PAD_OUT), jnp.float32),
        in_specs=[pl.BlockSpec(memory_space=pltpu.MemorySpace.VMEM)] * len(inputs),
        out_specs=pl.BlockSpec(memory_space=pltpu.MemorySpace.VMEM),
    )(*inputs)
    return out[:, :FUSION_OUT]


# ---------------------------------------------------------------------------
# Parameter construction (deterministic, PyTorch-style Linear init)
# ---------------------------------------------------------------------------
def _linear(key, fan_in, fan_out):
    k1, k2 = jax.random.split(key)
    bound = fan_in ** -0.5
    w = jax.random.uniform(k1, (fan_in, fan_out), jnp.float32, -bound, bound)
    b = jax.random.uniform(k2, (1, fan_out), jnp.float32, -bound, bound)
    return w, b


def init_params(key, input_dim, output_dim, feature_scales):
    keys = iter(jax.random.split(key, 8 * len(feature_scales) + 4))
    scales = []
    for d in feature_scales:
        win1, bin1 = _linear(next(keys), input_dim, d)
        gamma = jnp.ones((1, d), jnp.float32)
        beta = jnp.zeros((1, d), jnp.float32)
        win2, bin2 = _linear(next(keys), d, d)
        wout1, bout1 = _linear(next(keys), output_dim, d // 2)
        wout2, bout2 = _linear(next(keys), d // 2, d)
        scales.append(dict(win1=win1, bin1=bin1, gamma=gamma, beta=beta,
                           win2=win2, bin2=bin2, wout1=wout1, bout1=bout1,
                           wout2=wout2, bout2=bout2))
    total = 2 * feature_scales[0] + sum(2 * 2 ** (i - 1)
                                        for i in range(1, len(feature_scales)))
    wf1, bf1 = _linear(next(keys), total, FUSION_HIDDEN)
    wf2, bf2 = _linear(next(keys), FUSION_HIDDEN, FUSION_OUT)
    return dict(scales=scales, fusion=dict(w1=wf1, b1=bf1, w2=wf2, b2=bf2))


def pack_for_kernel(params, feature_scales):
    """Host-side folding + cross-scale concatenation -> 9 packed parameter slabs."""
    scales = params["scales"]
    f = params["fusion"]
    wf1 = f["w1"]                                       # (total, 128)

    # stage-1 weights / BN params concatenated across scales
    win1_cat = jnp.concatenate([p["win1"] for p in scales], axis=1)    # (in, 112)
    bin1_cat = jnp.concatenate([p["bin1"] for p in scales], axis=1)    # (1, 112)
    gamma_cat = jnp.concatenate([p["gamma"] for p in scales], axis=1)
    beta_cat = jnp.concatenate([p["beta"] for p in scales], axis=1)
    bn_pack = jnp.concatenate([bin1_cat, gamma_cat, beta_cat], axis=0)  # (3, 112)

    wout1_cat = jnp.concatenate([p["wout1"] for p in scales], axis=1)  # (out, 56)
    bout1_cat = jnp.concatenate([p["bout1"] for p in scales], axis=1)  # (1, 56)

    # fold Linear2 + adaptive pool + fusion Linear1 slices into effective weights
    win_eff_blocks, wout_eff_blocks = [], []
    bias_eff = f["b1"]                                                 # (1, 128)
    off = 0
    for i, d in enumerate(feature_scales):
        p = scales[i]
        width = d if i == 0 else 2 ** (i - 1)
        wf_in = wf1[off:off + width, :]; off += width
        wf_out = wf1[off:off + width, :]; off += width
        if i == 0:
            pin, pout = wf_in, wf_out                                  # identity "pool"
        else:
            P = _pool_matrix(d, width)                                 # (d, width)
            pin, pout = P @ wf_in, P @ wf_out                          # (d, 128)
        win_eff_blocks.append(p["win2"] @ pin)                         # (d, 128)
        wout_eff_blocks.append(p["wout2"] @ pout)                      # (d//2, 128)
        bias_eff = bias_eff + p["bin2"] @ pin + p["bout2"] @ pout
    win_eff = jnp.concatenate(win_eff_blocks, axis=0)                  # (112, 128)
    wout_eff = jnp.concatenate(wout_eff_blocks, axis=0)                # (56, 128)

    # pad fusion Linear2 to 128 output lanes (zero columns) for lane-dense stores
    wf2_pad = jnp.zeros((FUSION_HIDDEN, PAD_OUT), jnp.float32).at[:, :FUSION_OUT].set(f["w2"])
    bf2_pad = jnp.zeros((1, PAD_OUT), jnp.float32).at[:, :FUSION_OUT].set(f["b2"])

    bf16 = jnp.bfloat16
    return (win1_cat.astype(bf16), bn_pack, wout1_cat.astype(bf16), bout1_cat,
            win_eff.astype(bf16), wout_eff.astype(bf16), bias_eff,
            wf2_pad.astype(bf16), bf2_pad)


# ---------------------------------------------------------------------------
# Pure-JAX reference (verbatim translation of the PyTorch forward, train-mode BN, f32)
# ---------------------------------------------------------------------------
def reference(x, y, params, feature_scales):
    in_feats, out_feats = [], []
    for i, d in enumerate(feature_scales):
        p = params["scales"][i]
        h = x @ p["win1"] + p["bin1"]
        h = jnp.where(h > 0, h, LEAKY_SLOPE * h)
        mean = jnp.mean(h, axis=0, keepdims=True)
        var = jnp.mean((h - mean) ** 2, axis=0, keepdims=True)
        h = (h - mean) / jnp.sqrt(var + EPS) * p["gamma"] + p["beta"]
        in_feats.append(h @ p["win2"] + p["bin2"])
        g = jnp.maximum(y @ p["wout1"] + p["bout1"], 0.0)
        out_feats.append(g @ p["wout2"] + p["bout2"])

    def pool(v, L):
        cols = [jnp.mean(v[:, s:e], axis=1, keepdims=True)
                for s, e in _adaptive_bins(v.shape[1], L)]
        return jnp.concatenate(cols, axis=1)

    fused = []
    for i, (a, b) in enumerate(zip(in_feats, out_feats)):
        if i == 0:
            fused.append(jnp.concatenate([a, b], axis=1))
        else:
            L = 2 ** (i - 1)
            fused.append(jnp.concatenate([pool(a, L), pool(b, L)], axis=1))
    concat = jnp.concatenate(fused, axis=1)
    f = params["fusion"]
    h = jnp.maximum(concat @ f["w1"] + f["b1"], 0.0)
    return h @ f["w2"] + f["b2"]


# ---------------------------------------------------------------------------
if __name__ == "__main__":
    B, input_dim, output_dim = 8, 16, 8
    feature_scales = (16, 32, 64)

    key = jax.random.PRNGKey(0)
    kx, ky, kp = jax.random.split(key, 3)
    x = jax.random.normal(kx, (B, input_dim), jnp.float32)
    y = jax.random.normal(ky, (B, output_dim), jnp.float32)

    params = init_params(kp, input_dim, output_dim, feature_scales)
    packed = pack_for_kernel(params, feature_scales)

    out = forward(x, y, packed)
    jax.block_until_ready(out)

    ref = reference(x, y, params, feature_scales)
    assert out.shape == (B, FUSION_OUT)
    # bf16 MXU operands + host-side weight folding change FP association; use a
    # correspondingly looser tolerance against the f32 reference.
    assert jnp.allclose(out, ref, atol=5e-2, rtol=5e-2), "kernel does not match reference"
    print("KERNEL_OK")
</pallas_src>

<mosaic_0001>
module attributes {stable_mosaic.version = 11 : i64} {
  func.func @_fused_kernel(%arg0: memref<8x16xf32, #tpu.memory_space<vmem>>, %arg1: memref<8x8xf32, #tpu.memory_space<vmem>>, %arg2: memref<16x112xbf16, #tpu.memory_space<vmem>>, %arg3: memref<3x112xf32, #tpu.memory_space<vmem>>, %arg4: memref<8x56xbf16, #tpu.memory_space<vmem>>, %arg5: memref<1x56xf32, #tpu.memory_space<vmem>>, %arg6: memref<112x128xbf16, #tpu.memory_space<vmem>>, %arg7: memref<56x128xbf16, #tpu.memory_space<vmem>>, %arg8: memref<1x128xf32, #tpu.memory_space<vmem>>, %arg9: memref<128x128xbf16, #tpu.memory_space<vmem>>, %arg10: memref<1x128xf32, #tpu.memory_space<vmem>>, %arg11: memref<8x128xf32, #tpu.memory_space<vmem>>) attributes {dimension_semantics = [], scalar_prefetch = 0 : i64, scratch_operands = 0 : i64, tpu.core_type = #tpu.core_type<tc>} {
    %c0 = arith.constant 0 : index
    %c0_0 = arith.constant 0 : index
    %0 = vector.load %arg0[%c0, %c0_0] : memref<8x16xf32, #tpu.memory_space<vmem>>, vector<8x16xf32>
    %c0_1 = arith.constant 0 : index
    %c0_2 = arith.constant 0 : index
    %1 = vector.load %arg1[%c0_1, %c0_2] : memref<8x8xf32, #tpu.memory_space<vmem>>, vector<8x8xf32>
    %c0_3 = arith.constant 0 : index
    %c0_4 = arith.constant 0 : index
    %2 = vector.load %arg3[%c0_3, %c0_4] : memref<3x112xf32, #tpu.memory_space<vmem>>, vector<3x112xf32>
    %3 = vector.extract_strided_slice %2 {offsets = [0, 0], sizes = [1, 112], strides = [1, 1]} : vector<3x112xf32> to vector<1x112xf32>
    %4 = vector.extract_strided_slice %2 {offsets = [1, 0], sizes = [1, 112], strides = [1, 1]} : vector<3x112xf32> to vector<1x112xf32>
    %5 = vector.extract_strided_slice %2 {offsets = [2, 0], sizes = [1, 112], strides = [1, 1]} : vector<3x112xf32> to vector<1x112xf32>
    %6 = arith.truncf %0 : vector<8x16xf32> to vector<8x16xbf16>
    %c0_5 = arith.constant 0 : index
    %c0_6 = arith.constant 0 : index
    %7 = vector.load %arg2[%c0_5, %c0_6] : memref<16x112xbf16, #tpu.memory_space<vmem>>, vector<16x112xbf16>
    %cst = arith.constant dense<0.000000e+00> : vector<8x112xf32>
    %8 = tpu.matmul %6, %7, %cst {dimension_numbers = #tpu.dot_dimension_numbers<[1], [0], [0], [1], [0, 0, 1, 1], [], []>} : vector<8x16xbf16>, vector<16x112xbf16>, vector<8x112xf32> -> vector<8x112xf32>
    %9 = vector.broadcast %3 : vector<1x112xf32> to vector<8x112xf32>
    %10 = arith.addf %8, %9 : vector<8x112xf32>
    %cst_7 = arith.constant 0.000000e+00 : f32
    %11 = vector.broadcast %cst_7 : f32 to vector<8x112xf32>
    %12 = arith.cmpf ogt, %10, %11 : vector<8x112xf32>
    %cst_8 = arith.constant 2.000000e-01 : f32
    %13 = vector.broadcast %cst_8 : f32 to vector<8x112xf32>
    %14 = arith.mulf %13, %10 : vector<8x112xf32>
    %15 = arith.select %12, %10, %14 : vector<8x112xi1>, vector<8x112xf32>
    %cst_9 = arith.constant dense<0.000000e+00> : vector<112xf32>
    %16 = vector.multi_reduction <add>, %15, %cst_9 [0] : vector<8x112xf32> to vector<112xf32>
    %17 = vector.shape_cast %16 : vector<112xf32> to vector<1x112xf32>
    %cst_10 = arith.constant 8.000000e+00 : f32
    %18 = vector.broadcast %cst_10 : f32 to vector<1x112xf32>
    %19 = arith.divf %17, %18 : vector<1x112xf32>
    %20 = arith.mulf %15, %15 : vector<8x112xf32>
    %cst_11 = arith.constant dense<0.000000e+00> : vector<112xf32>
    %21 = vector.multi_reduction <add>, %20, %cst_11 [0] : vector<8x112xf32> to vector<112xf32>
    %22 = vector.shape_cast %21 : vector<112xf32> to vector<1x112xf32>
    %cst_12 = arith.constant 8.000000e+00 : f32
    %23 = vector.broadcast %cst_12 : f32 to vector<1x112xf32>
    %24 = arith.divf %22, %23 : vector<1x112xf32>
    %25 = arith.mulf %19, %19 : vector<1x112xf32>
    %26 = arith.subf %24, %25 : vector<1x112xf32>
    %27 = vector.broadcast %19 : vector<1x112xf32> to vector<8x112xf32>
    %28 = arith.subf %15, %27 : vector<8x112xf32>
    %cst_13 = arith.constant 9.99999974E-6 : f32
    %29 = vector.broadcast %cst_13 : f32 to vector<1x112xf32>
    %30 = arith.addf %26, %29 : vector<1x112xf32>
    %31 = math.rsqrt %30 : vector<1x112xf32>
    %32 = vector.broadcast %31 : vector<1x112xf32> to vector<8x112xf32>
    %33 = arith.mulf %28, %32 : vector<8x112xf32>
    %34 = vector.broadcast %4 : vector<1x112xf32> to vector<8x112xf32>
    %35 = arith.mulf %33, %34 : vector<8x112xf32>
    %36 = vector.broadcast %5 : vector<1x112xf32> to vector<8x112xf32>
    %37 = arith.addf %35, %36 : vector<8x112xf32>
    %38 = arith.truncf %1 : vector<8x8xf32> to vector<8x8xbf16>
    %c0_14 = arith.constant 0 : index
    %c0_15 = arith.constant 0 : index
    %39 = vector.load %arg4[%c0_14, %c0_15] : memref<8x56xbf16, #tpu.memory_space<vmem>>, vector<8x56xbf16>
    %cst_16 = arith.constant dense<0.000000e+00> : vector<8x56xf32>
    %40 = tpu.matmul %38, %39, %cst_16 {dimension_numbers = #tpu.dot_dimension_numbers<[1], [0], [0], [1], [0, 0, 1, 1], [], []>} : vector<8x8xbf16>, vector<8x56xbf16>, vector<8x56xf32> -> vector<8x56xf32>
    %c0_17 = arith.constant 0 : index
    %c0_18 = arith.constant 0 : index
    %41 = vector.load %arg5[%c0_17, %c0_18] : memref<1x56xf32, #tpu.memory_space<vmem>>, vector<1x56xf32>
    %42 = vector.broadcast %41 : vector<1x56xf32> to vector<8x56xf32>
    %43 = arith.addf %40, %42 : vector<8x56xf32>
    %cst_19 = arith.constant 0.000000e+00 : f32
    %44 = vector.broadcast %cst_19 : f32 to vector<8x56xf32>
    %45 = arith.maximumf %43, %44 : vector<8x56xf32>
    %46 = arith.truncf %37 : vector<8x112xf32> to vector<8x112xbf16>
    %c0_20 = arith.constant 0 : index
    %c0_21 = arith.constant 0 : index
    %47 = vector.load %arg6[%c0_20, %c0_21] : memref<112x128xbf16, #tpu.memory_space<vmem>>, vector<112x128xbf16>
    %cst_22 = arith.constant dense<0.000000e+00> : vector<8x128xf32>
    %48 = tpu.matmul %46, %47, %cst_22 {dimension_numbers = #tpu.dot_dimension_numbers<[1], [0], [0], [1], [0, 0, 1, 1], [], []>} : vector<8x112xbf16>, vector<112x128xbf16>, vector<8x128xf32> -> vector<8x128xf32>
    %49 = arith.truncf %45 : vector<8x56xf32> to vector<8x56xbf16>
    %c0_23 = arith.constant 0 : index
    %c0_24 = arith.constant 0 : index
    %50 = vector.load %arg7[%c0_23, %c0_24] : memref<56x128xbf16, #tpu.memory_space<vmem>>, vector<56x128xbf16>
    %cst_25 = arith.constant dense<0.000000e+00> : vector<8x128xf32>
    %51 = tpu.matmul %49, %50, %cst_25 {dimension_numbers = #tpu.dot_dimension_numbers<[1], [0], [0], [1], [0, 0, 1, 1], [], []>} : vector<8x56xbf16>, vector<56x128xbf16>, vector<8x128xf32> -> vector<8x128xf32>
    %52 = arith.addf %48, %51 : vector<8x128xf32>
    %c0_26 = arith.constant 0 : index
    %c0_27 = arith.constant 0 : index
    %53 = vector.load %arg8[%c0_26, %c0_27] : memref<1x128xf32, #tpu.memory_space<vmem>>, vector<1x128xf32>
    %54 = vector.broadcast %53 : vector<1x128xf32> to vector<8x128xf32>
    %55 = arith.addf %52, %54 : vector<8x128xf32>
    %cst_28 = arith.constant 0.000000e+00 : f32
    %56 = vector.broadcast %cst_28 : f32 to vector<8x128xf32>
    %57 = arith.maximumf %55, %56 : vector<8x128xf32>
    %58 = arith.truncf %57 : vector<8x128xf32> to vector<8x128xbf16>
    %c0_29 = arith.constant 0 : index
    %c0_30 = arith.constant 0 : index
    %59 = vector.load %arg9[%c0_29, %c0_30] : memref<128x128xbf16, #tpu.memory_space<vmem>>, vector<128x128xbf16>
    %cst_31 = arith.constant dense<0.000000e+00> : vector<8x128xf32>
    %60 = tpu.matmul %58, %59, %cst_31 {dimension_numbers = #tpu.dot_dimension_numbers<[1], [0], [0], [1], [0, 0, 1, 1], [], []>} : vector<8x128xbf16>, vector<128x128xbf16>, vector<8x128xf32> -> vector<8x128xf32>
    %c0_32 = arith.constant 0 : index
    %c0_33 = arith.constant 0 : index
    %61 = vector.load %arg10[%c0_32, %c0_33] : memref<1x128xf32, #tpu.memory_space<vmem>>, vector<1x128xf32>
    %62 = vector.broadcast %61 : vector<1x128xf32> to vector<8x128xf32>
    %63 = arith.addf %60, %62 : vector<8x128xf32>
    %c0_34 = arith.constant 0 : index
    %c0_35 = arith.constant 0 : index
    %64 = vector.load %arg11[%c0_34, %c0_35] : memref<8x128xf32, #tpu.memory_space<vmem>>, vector<8x128xf32>
    tpu.vector_store %arg11[%c0_34, %c0_35], %63 {strides = array<i32>} : memref<8x128xf32, #tpu.memory_space<vmem>>, vector<8x128xf32>,
    return
  }
}

</mosaic_0001>

<bundles_post_ra>
// kernel: tpu_custom_call.1
= control target key start
LH: loop header
LB: loop body
LE: loop exit
PB: predicated region body
PF: predicated region fallthrough
CT: control target
= control target key end

     0   :  { %16 = vsyncpa [#allocation3], 0  ;;  %s1081_s0 = inlined_call_operand.hbm [shape: f32[8,16], index: 0, kind: input, shape index: {}]   ;;  %s1082_s1 = inlined_call_operand.hbm [shape: f32[8,8], index: 1, kind: input, shape index: {}]   ;;  %s1083_s2 = inlined_call_operand.hbm [shape: bf16[16,112], index: 2, kind: input, shape index: {}]   ;;  %s1084_s3 = inlined_call_operand.vmem [shape: f32[3,112], index: 3, kind: input, shape index: {}]   ;;  %s1085_s4 = inlined_call_operand.hbm [shape: bf16[8,56], index: 4, kind: input, shape index: {}]   ;;  %s1086_s5 = inlined_call_operand.vmem [shape: f32[1,56], index: 5, kind: input, shape index: {}]   ;;  %s1087_s6 = inlined_call_operand.hbm [shape: bf16[112,128], index: 6, kind: input, shape index: {}]   ;;  %s1088_s7 = inlined_call_operand.hbm [shape: bf16[56,128], index: 7, kind: input, shape index: {}]   ;;  %s1089_s8 = inlined_call_operand.vmem [shape: f32[1,128], index: 8, kind: input, shape index: {}]   ;;  %s1090_s9 = inlined_call_operand.hbm [shape: bf16[128,128], index: 9, kind: input, shape index: {}]   ;;  %s1091_s10 = inlined_call_operand.vmem [shape: f32[1,128], index: 10, kind: input, shape index: {}]   ;;  %s1092_s11 = inlined_call_operand.hbm [shape: f32[8,128], index: 11, kind: output, shape index: {}]  }
   0x1   :  { %17 = vsyncpa [#allocation6], 0 }
   0x2   :  { %18 = vsyncpa [#allocation9], 0 }
   0x3   :  { %19 = vsyncpa [#allocation12], 0 }
   0x4   :  { %20 = vsyncpa [#allocation4], 0  ;;  %s920_s17 = smov [#allocation5]   ;;  %s921_s19 = smov [#allocation8]  }
   0x5   :  { %s37_s18 = sshll.u32 %s920_s17, 4  ;;  %s61_s20 = sshll.u32 %s921_s19, 4  ;;  %s38_s18 = int_to_ptr.vmem [resolvable:$true] %s37_s18  ;;  %s62_s20 = int_to_ptr.vmem [resolvable:$true] %s61_s20 }
   0x6   :  { %s758_s21 = scalar_lea.vmem %s38_s18, 128  ;;  %p763_p1 = scmp.lt.s32.totalorder %s38_s18, %s38_s18 }
   0x7   :  { %p759_p0 = scmp.ne.s32.totalorder %s38_s18, %s758_s21  ;;  %p764_p2 = scmp.lt.s32.totalorder %s758_s21, %s758_s21 }
   0x9   :  { %p765_p3 = por %p764_p2, %p763_p1 }
   0xb   :  { %p766_p4 = pnand %p765_p3, %p759_p0 }
   0xd   :  { %769 = shalt.err (!%p766_p4)
}
   0xe   :  { %40 = dma.hbm_to_vmem [thread:$0]  %s1082_s1, 128, %s38_s18, [#allocation6]  }
   0xf   :  { %s778_s24 = scalar_lea.vmem %s62_s20, 64  ;;  %p783_p6 = scmp.lt.s32.totalorder %s62_s20, %s62_s20 }
  0x10   :  { %p779_p5 = scmp.ne.s32.totalorder %s62_s20, %s778_s24  ;;  %p784_p7 = scmp.lt.s32.totalorder %s778_s24, %s778_s24 }
  0x12   :  { %p785_p8 = por %p784_p7, %p783_p6 }
  0x14   :  { %p786_p9 = pnand %p785_p8, %p779_p5 }
  0x16   :  { %789 = shalt.err (!%p786_p9)
}
  0x17   :  { %64 = dma.hbm_to_vmem [thread:$0]  %s1085_s4, 64, %s62_s20, [#allocation9]  }
  0x18   :  { %s922_s27 = smov [#allocation11]   ;;  %s923_s29 = smov [#allocation2]  }
  0x19   :  { %s84_s28 = sshll.u32 %s922_s27, 4  ;;  %s27_s30 = sshll.u32 %s923_s29, 4  ;;  %s85_s28 = int_to_ptr.vmem [resolvable:$true] %s84_s28  ;;  %s28_s30 = int_to_ptr.vmem [resolvable:$true] %s27_s30 }
  0x1a   :  { %s798_s12 = scalar_lea.vmem %s85_s28, 448  ;;  %p803_p11 = scmp.lt.s32.totalorder %s85_s28, %s85_s28 }
  0x1b   :  { %p799_p10 = scmp.ne.s32.totalorder %s85_s28, %s798_s12  ;;  %p804_p12 = scmp.lt.s32.totalorder %s798_s12, %s798_s12 }
  0x1d   :  { %p805_p13 = por %p804_p12, %p803_p11 }
  0x1f   :  { %p806_p0 = pnand %p805_p13, %p799_p10 }
  0x21   :  { %809 = shalt.err (!%p806_p0)
}
  0x22   :  { %s924_s1 = smov 64   ;;  %s925_s13 = smov 4  }
  0x23   :  { %90 = dma.hbm_to_vmem [thread:$0]  %s1088_s7, 448, %s85_s28, [#allocation12], %s924_s1, %s924_s1, %s925_s13  }
  0x24   :  { %s818_s15 = scalar_lea.vmem %s28_s30, 128  ;;  %p823_p2 = scmp.lt.s32.totalorder %s28_s30, %s28_s30 }
  0x25   :  { %p819_p1 = scmp.ne.s32.totalorder %s28_s30, %s818_s15  ;;  %p824_p3 = scmp.lt.s32.totalorder %s818_s15, %s818_s15 }
  0x27   :  { %p825_p4 = por %p824_p3, %p823_p2 }
  0x29   :  { %p826_p5 = pnand %p825_p4, %p819_p1 }
  0x2b   :  { %829 = shalt.err (!%p826_p5)
}
  0x2c   :  { %30 = dma.hbm_to_vmem [thread:$0]  %s1081_s0, 128, %s28_s30, [#allocation3]  }
  0x2d   :  { %s926_s18 = smov [#allocation7]   ;;  %s927_s20 = smov [#allocation10]  }
  0x2e   :  { %s46_s19 = sshll.u32 %s926_s18, 4  ;;  %s72_s21 = sshll.u32 %s927_s20, 4  ;;  %s47_s19 = int_to_ptr.vmem [resolvable:$true] %s46_s19  ;;  %s73_s21 = int_to_ptr.vmem [resolvable:$true] %s72_s21 }
  0x2f   :  { %s838_s22 = scalar_lea.vmem %s47_s19, 128  ;;  %p843_p7 = scmp.lt.s32.totalorder %s47_s19, %s47_s19 }
  0x30   :  { %p839_p6 = scmp.ne.s32.totalorder %s47_s19, %s838_s22  ;;  %p844_p8 = scmp.lt.s32.totalorder %s838_s22, %s838_s22 }
  0x32   :  { %p845_p9 = por %p844_p8, %p843_p7 }
  0x34   :  { %p846_p10 = pnand %p845_p9, %p839_p6 }
  0x36   :  { %849 = shalt.err (!%p846_p10)
}
  0x37   :  { %52 = dma.hbm_to_vmem [thread:$0]  %s1083_s2, 128, %s47_s19, [#allocation6], %s924_s1, %s924_s1, %s925_s13  }
  0x38   :  { %s858_s0 = scalar_lea.vmem %s73_s21, 896  ;;  %p863_p12 = scmp.lt.s32.totalorder %s73_s21, %s73_s21 }
  0x39   :  { %p859_p11 = scmp.ne.s32.totalorder %s73_s21, %s858_s0  ;;  %p864_p13 = scmp.lt.s32.totalorder %s858_s0, %s858_s0 }
  0x3b   :  { %p865_p0 = por %p864_p13, %p863_p12 }
  0x3d   :  { %p866_p1 = pnand %p865_p0, %p859_p11 }
  0x3f   :  { %869 = shalt.err (!%p866_p1)
}
  0x40   :  { %78 = dma.hbm_to_vmem [thread:$0]  %s1087_s6, 896, %s73_s21, [#allocation9], %s924_s1, %s924_s1, %s925_s13  }
  0x41   :  { %s928_s26 = smov [#allocation13]  }
  0x42   :  { %s98_s27 = sshll.u32 %s928_s26, 4  ;;  %s99_s27 = int_to_ptr.vmem [resolvable:$true] %s98_s27 }
  0x43   :  { %s878_s28 = scalar_lea.vmem %s99_s27, 1024  ;;  %p883_p3 = scmp.lt.s32.totalorder %s99_s27, %s99_s27 }
  0x44   :  { %p879_p2 = scmp.ne.s32.totalorder %s99_s27, %s878_s28  ;;  %p884_p4 = scmp.lt.s32.totalorder %s878_s28, %s878_s28 }
  0x46   :  { %p885_p5 = por %p884_p4, %p883_p3 }
  0x48   :  { %p886_p6 = pnand %p885_p5, %p879_p2 }
  0x4a   :  { %889 = shalt.err (!%p886_p6)
}
  0x4b   :  { %104 = dma.hbm_to_vmem [thread:$0]  %s1090_s9, 1024, %s99_s27, [#allocation12], %s924_s1, %s924_s1, %s925_s13  }
  0x4c   :  { %910 = dma.done.wait [#allocation3], 128  }
  0x4d   :  { %911 = vsyncadd [#allocation3], 4294967168 }
  0x4e   :  { %912 = dma.done.wait [#allocation6], 256  }
  0x4f   :  { %913 = vsyncadd [#allocation6], 4294967040 }
  0x50   :  { %914 = dma.done.wait [#allocation9], 960  }
  0x51   :  { %915 = vsyncadd [#allocation9], 4294966336 }
  0x52   :  { %916 = dma.done.wait [#allocation12], 1472  }
  0x53   :  { %917 = vsyncadd [#allocation12], 4294965824  ;;  %v929_v0 = vmov 0.0   ;;  %vm930_vm0 = vmmov 0   ;;  %vm240_vm1 = vcmask 1043456   ;;  %v728_v1 = vld [vmem:[#allocation7] sm:$0xff]   ;;  %v135_v20 = vlaneseq }
  0x54   :  { %654 = vmatprep.subr.bf16.mxu1 %v929_v0  ;;  %656 = vmatprep.mubr.msk.bf16.mxu1 %vm930_vm0, %v929_v0  ;;  %v129_v2 = vld [vmem:[#allocation2] sm:$0xff]  ;;  %v228_v3 = vld [vmem:[#allocation8] sm:$0xf]  ;;  %vm145_vm2 = vcmask 130048   ;;  %vm236_vm3 = vcmask 64512   ;;  %v130_v6 = vld [vmem:[#allocation5] sm:$0xff] }
  0x55   :  { %666 = vmatprep.subr.bf16.mxu0 %v929_v0  ;;  %674 = vmatprep.mubr.msk.bf16.mxu0 %vm930_vm0, %v929_v0  ;;  %v132_v4 = vpack.c.bf16 %v129_v2, %v129_v2  ;;  %v242_v5 = vsel %vm240_vm1, %v228_v3, 0  ;;  %v227_v7 = vpack.c.bf16 %v130_v6, %v130_v6  ;;  %v729_v8 = vld [vmem:[#allocation10 + $0x30] sm:$0xff]   ;;  %v730_v10 = vld [vmem:[#allocation10 + $0x28] sm:$0xff]   ;;  %v732_v13 = vld [vmem:[#allocation10 + $0x20] sm:$0xff]   ;;  %v1049_v21 = vshrl.u32 %v135_v20, 7  ;;  %s931_s14 = smov [#allocation14]  }
  0x56   :  { %655 = vmatpush3.bf16.msra.mxu1 %v728_v1  ;;  %v731_v9 = vld [vmem:[#allocation11 + $0x18] ss:$0 sps:$4 sm:$0xff]   ;;  %v733_v12 = vld [vmem:[#allocation11 + $0x10] sm:$0xff]   ;;  %v735_v14 = vld [vmem:[#allocation11 + $0x8] sm:$0xff]   ;;  %vm192_vm5 = vcmask 916480   ;;  %vm329_vm6 = vcmask 457728  }
  0x57   :  { %660 = vmatprep.subr.bf16.mxu1 %v929_v0  ;;  %v334_v11 = vsel %vm240_vm1, %v731_v9, 0  ;;  %v734_v15 = vld [vmem:[#allocation10 + $0x18] sm:$0xff]   ;;  %v736_v17 = vld [vmem:[#allocation10 + $0x10] sm:$0xff]   ;;  %v738_v18 = vld [vmem:[#allocation10 + $0x8] sm:$0xff]   ;;  %v137_v22 = vsub.s32 0, %v1049_v21  ;;  %v219_v1 = vsub.s32 1, %v1049_v21 }
  0x58   :  { %667 = vmatpush3.bf16.msra.mxu0 %v334_v11  ;;  %v737_v16 = vld [vmem:[#allocation11] sm:$0xff]   ;;  %v739_v19 = vld [vmem:[#allocation10] sm:$0xff]   ;;  %v740_v46 = vld [vmem:[#allocation13 + $0x38] sm:$0xff]   ;;  %v224_v2 = vsub.s32 2, %v1049_v21  ;;  %s589_s4 = sshll.u32 %s931_s14, 4  ;;  %s590_s4 = int_to_ptr.vmem [resolvable:$true] %s589_s4 }
  0x59   :  { %657 = vmatmul.mubr.msk.bf16.vlgmr.msra.gmra.mxu1 %vm145_vm2, %v132_v4  ;;  %668 = vmatprep.subr.bf16.mxu0 %v929_v0  ;;  %v131_v23 = vld [vmem:[%s1084_s3] sm:$0x7]  ;;  %v742_v58 = vld [vmem:[#allocation13 + $0x28] sm:$0xff]   ;;  %v743_v62 = vld [vmem:[#allocation13 + $0x20] sm:$0xff]   ;;  %p895_p8 = scmp.lt.s32.totalorder %s590_s4, %s590_s4 }
  0x5a   :  { %661 = vmatpush3.bf16.msra.mxu1 %v242_v5  ;;  %662 = vmatprep.mubr.msk.bf16.mxu1 %vm930_vm0, %v929_v0  ;;  %v138_v24 = vrot.slane %v131_v23, %v137_v22  ;;  %v603_v33 = vld [vmem:[%s1086_s5] ss:$0 sm:$0xff]  ;;  %v220_v3 = vrot.slane %v131_v23, %v219_v1  ;;  %v225_v6 = vrot.slane %v131_v23, %v224_v2  ;;  %v744_v11 = vld [vmem:[#allocation13 + $0x18] sm:$0xff]  }
  0x5b   :  { %678 = vmatprep.subr.bf16.mxu1 %v929_v0  ;;  %v741_v53 = vld [vmem:[#allocation13 + $0x30] sm:$0xff]  }
  0x5c   :  { %669 = vmatpush3.bf16.msra.mxu0 %v733_v12  ;;  %v745_v12 = vld [vmem:[#allocation13 + $0x10] sm:$0xff]  }
  0x5d   :  { %670 = vmatprep.subr.bf16.mxu0 %v929_v0  ;;  %v618_v20 = vld [vmem:[%s1089_s8] ss:$0 sm:$0xff]  ;;  %s890_s8 = scalar_lea.vmem %s590_s4, 128 }
  0x5e   :  { %p891_p7 = scmp.ne.s32.totalorder %s590_s4, %s890_s8  ;;  %p896_p9 = scmp.lt.s32.totalorder %s890_s8, %s890_s8 }
  0x60   :  { %671 = vmatpush3.bf16.msra.mxu0 %v735_v14  ;;  %v747_v14 = vld [vmem:[#allocation13] sm:$0xff]   ;;  %p897_p10 = por %p896_p9, %p895_p8 }
  0x61   :  { %663 = vmatmul.mubr.msk.bf16.vlgmr.msra.gmra.mxu1 %vm236_vm3, %v227_v7  ;;  %672 = vmatprep.subr.bf16.mxu0 %v929_v0 }
  0x62   :  { %692 = vmatprep.mubr.msk.bf16.mxu1 %vm930_vm0, %v929_v0  ;;  %679 = vmatpush3.bf16.msra.mxu1 %v729_v8  ;;  %p898_p11 = pnand %p897_p10, %p891_p7 }
  0x63   :  { %680 = vmatprep.subr.bf16.mxu1 %v929_v0 }
  0x64   :  { %673 = vmatpush3.bf16.msra.mxu0 %v737_v16 }
  0x65   :  { %696 = vmatprep.subr.bf16.mxu0 %v929_v0 }
  0x66   :  { %681 = vmatpush3.bf16.msra.mxu1 %v730_v10 }
  0x67   :  { %682 = vmatprep.subr.bf16.mxu1 %v929_v0 }
  0x6a   :  { %683 = vmatpush3.bf16.msra.mxu1 %v732_v13  ;;  %v746_v13 = vld [vmem:[#allocation13 + $0x8] sm:$0xff]  }
  0x6b   :  { %684 = vmatprep.subr.bf16.mxu1 %v929_v0 }
  0x6e   :  { %685 = vmatpush3.bf16.msra.mxu1 %v734_v15 }
  0x6f   :  { %686 = vmatprep.subr.bf16.mxu1 %v929_v0 }
  0x72   :  { %687 = vmatpush3.bf16.msra.mxu1 %v736_v17 }
  0x73   :  { %688 = vmatprep.subr.bf16.mxu1 %v929_v0 }
  0x76   :  { %689 = vmatpush3.bf16.msra.mxu1 %v738_v18 }
  0x77   :  { %690 = vmatprep.subr.bf16.mxu1 %v929_v0 }
  0x7a   :  { %691 = vmatpush3.bf16.msra.mxu1 %v739_v19 }
 0x119   :  { %v183_v25 = vpop.f32.mrf.mxu1 }
 0x11a   :  { %v184_v26 = vadd.f32 %v183_v25, %v138_v24 }
 0x11b   :  { %v658_v27 = vpop.f32.mrf.mxu1 }
 0x11c   :  { %vm189_vm4 = vcmp.gt.f32.partialorder %v184_v26, 0.0  ;;  %v190_v28 = vmul.f32 0.2, %v184_v26 }
 0x11d   :  { %v186_v29 = vpop.f32.mrf.mxu1 }
 0x11e   :  { %v191_v30 = vsel %vm189_vm4, %v184_v26, %v190_v28 }
 0x11f   :  { %v202_v31 = vmul.f32 %v191_v30, %v191_v30  ;;  %v659_v32 = vpop.f32.mrf.mxu1  ;;  %v193_v34 = vsel %vm192_vm5, %v191_v30, 0.0 }
 0x120   :  { %v194_v35 = vrot.slane %v193_v34, 4 }
 0x121   :  { %v278_v36 = vpop.f32.mrf.mxu1  ;;  %v203_v37 = vsel %vm192_vm5, %v202_v31, 0.0 }
 0x122   :  { %v279_v38 = vadd.f32 %v603_v33, %v278_v36  ;;  %v195_v39 = vadd.f32 %v194_v35, %v193_v34  ;;  %v204_v40 = vrot.slane %v203_v37, 4 }
 0x123   :  { %v664_v41 = vpop.f32.mrf.mxu1 }
 0x124   :  { %v284_v42 = vmax.f32 %v279_v38, 0.0  ;;  %v196_v43 = vrot.slane %v195_v39, 2  ;;  %v205_v44 = vadd.f32 %v204_v40, %v203_v37 }
 0x125   :  { %v281_v45 = vpop.f32.mrf.mxu1 }
 0x126   :  { %v300_v47 = vpack.c.bf16 %v284_v42, %v284_v42  ;;  %v197_v48 = vadd.f32 %v196_v43, %v195_v39  ;;  %v206_v49 = vrot.slane %v205_v44, 2 }
 0x127   :  { %v665_v50 = vpop.f32.mrf.mxu1 }
 0x128   :  { %675 = vmatmul.mubr.msk.bf16.vlgmr.msra.gmra.mxu0 %vm329_vm6, %v300_v47  ;;  %v198_v51 = vrot.slane %v197_v48, 1  ;;  %v207_v52 = vadd.f32 %v206_v49, %v205_v44 }
 0x129   :  { %697 = vmatpush3.bf16.msra.mxu0 %v740_v46  ;;  %712 = vmatprep.mubr.msk.bf16.mxu0 %vm930_vm0, %v929_v0 }
 0x12a   :  { %v199_v54 = vadd.f32 %v198_v51, %v197_v48  ;;  %v208_v55 = vrot.slane %v207_v52, 1  ;;  %698 = vmatprep.subr.bf16.mxu0 %v929_v0 }
 0x12c   :  { %v201_v56 = vmul.f32 0.125, %v199_v54  ;;  %v209_v57 = vadd.f32 %v208_v55, %v207_v52 }
 0x12d   :  { %699 = vmatpush3.bf16.msra.mxu0 %v741_v53 }
 0x12e   :  { %v210_v59 = vmul.f32 0.125, %v209_v57  ;;  %v211_v60 = vmul.f32 %v201_v56, %v201_v56  ;;  %700 = vmatprep.subr.bf16.mxu0 %v929_v0  ;;  %v213_v4 = vsub.f32 %v191_v30, %v201_v56 }
 0x130   :  { %v212_v61 = vsub.f32 %v210_v59, %v211_v60 }
 0x131   :  { %701 = vmatpush3.bf16.msra.mxu0 %v742_v58 }
 0x132   :  { %v214_v63 = vadd.f32 1e-05, %v212_v61  ;;  %702 = vmatprep.subr.bf16.mxu0 %v929_v0 }
 0x134   :  { %748 = vrsqrt.f32 %v214_v63 }
 0x135   :  { %703 = vmatpush3.bf16.msra.mxu0 %v743_v62 }
 0x136   :  { %704 = vmatprep.subr.bf16.mxu0 %v929_v0 }
 0x139   :  { %705 = vmatpush3.bf16.msra.mxu0 %v744_v11 }
 0x13a   :  { %706 = vmatprep.subr.bf16.mxu0 %v929_v0 }
 0x13d   :  { %707 = vmatpush3.bf16.msra.mxu0 %v745_v12 }
 0x13e   :  { %708 = vmatprep.subr.bf16.mxu0 %v929_v0 }
 0x141   :  { %v749_v5 = vpop.eup %748  ;;  %709 = vmatpush3.bf16.msra.mxu0 %v746_v13 }
 0x142   :  { %v216_v7 = vmul.f32 %v749_v5, %v213_v4  ;;  %710 = vmatprep.subr.bf16.mxu0 %v929_v0  ;;  %v619_v0 = vld [vmem:[%s1091_s10] ss:$0 sm:$0xff] }
 0x144   :  { %v221_v8 = vmul.f32 %v220_v3, %v216_v7 }
 0x145   :  { %711 = vmatpush3.bf16.msra.mxu0 %v747_v14 }
 0x146   :  { %v226_v9 = vadd.f32 %v225_v6, %v221_v8 }
 0x148   :  { %v285_v10 = vpack.c.bf16 %v226_v9, %v226_v9 }
 0x14a   :  { %693 = vmatmul.mubr.msk.bf16.vlgmr.msra.gmra.mxu1 %vm192_vm5, %v285_v10 }
 0x1e8   :  { %v370_v15 = vpop.f32.mrf.mxu0 }
 0x1ea   :  { %v676_v16 = vpop.f32.mrf.mxu0 }
 0x1ec   :  { %v373_v17 = vpop.f32.mrf.mxu0 }
 0x1ee   :  { %v677_v18 = vpop.f32.mrf.mxu0 }
 0x20a   :  { %v455_v19 = vpop.f32.mrf.mxu1 }
 0x20b   :  { %v456_v21 = vadd.f32 %v455_v19, %v370_v15 }
 0x20c   :  { %v694_v22 = vpop.f32.mrf.mxu1 }
 0x20d   :  { %v468_v23 = vadd.f32 %v618_v20, %v456_v21 }
 0x20e   :  { %v458_v24 = vpop.f32.mrf.mxu1 }
 0x20f   :  { %v469_v25 = vmax.f32 %v468_v23, 0.0 }
 0x210   :  { %v695_v26 = vpop.f32.mrf.mxu1 }
 0x211   :  { %v470_v27 = vpack.c.bf16 %v469_v25, %v469_v25 }
 0x213   :  { %713 = vmatmul.mubr.bf16.vlgmr.msra.gmra.mxu0 %v470_v27 }
 0x2d3   :  { %v576_v28 = vpop.f32.mrf.mxu0 }
 0x2d4   :  { %v577_v29 = vadd.f32 %v619_v0, %v576_v28 }
 0x2d5   :  { %v714_v30 = vpop.f32.mrf.mxu0 }
 0x2d6   :  { %582 = vst [vmem:[#allocation14] sm:$0xff] %v577_v29 }
 0x2d7   :  { %v579_v31 = vpop.f32.mrf.mxu0 }
 0x2d8   :  { %901 = shalt.err (!%p898_p11)
}
 0x2d9   :  { %592 = dma.vmem_to_hbm [thread:$0]  %s590_s4, 128, %s1092_s11, [#allocation4]   ;;  %v715_v32 = vpop.f32.mrf.mxu0 }
 0x2da   :  { %918 = dma.done.wait [#allocation4], 128  }
 0x2db   :  { %919 = vsyncadd [#allocation4], 4294967168 }
 0x2dc   :  { %596 = vsyncpa [#allocation3], 1 }
 0x2dd   :  { %597 = vsyncpa [#allocation6], 1 }
 0x2de   :  { %598 = vsyncpa [#allocation9], 1 }
 0x2df   :  { %599 = vsyncpa [#allocation12], 1 }
 0x2e0   :  { %600 = vsyncpa [#allocation4], 1 }

</bundles_post_ra>
